<compile_context>
chip_gen: v5e
topology: v5e:2x2
jax: 0.10.0
libtpu: 0.0.40
codegen_flags: <defaults>
</compile_context>

<pallas_src>
import functools
import math

import jax
import jax.numpy as jnp
from jax.experimental import pallas as pl
from jax.experimental.pallas import tpu as pltpu  # noqa: F401  (kept for TPU-specific tuning hooks)


def gcn_kernel(x_ref, w_ref, adj_ref, bias_ref, out_ref, *, batch, node_n):
    # Single MXU matmul for the whole batch: support = x2d @ W  -> (B*N, Fout)
    support = jnp.dot(x_ref[...], w_ref[...], preferred_element_type=jnp.float32)

    adj = adj_ref[...]          # (N, N)  precomputed att + edge
    bias = bias_ref[...]        # (1, Fout), f32

    # Per-batch aggregation: out[b] = adj @ support[b] + bias.
    # B is tiny and static -> fully unrolled loop with static (sublane-aligned) slices.
    for b in range(batch):
        lo = b * node_n
        sb = support[lo:lo + node_n, :].astype(adj.dtype)
        out_b = jnp.dot(adj, sb, preferred_element_type=jnp.float32) + bias
        out_ref[lo:lo + node_n, :] = out_b.astype(out_ref.dtype)


def graph_convolution(x, weight, att, pre, coef, bias, *, mxu_dtype=None):
    """x: (B, N, Fin); weight: (Fin, Fout); att: (N, N); pre: (12, N, N);
    coef: (12,) scalar edge coefficients; bias: (Fout,).

    mxu_dtype: optional dtype (e.g. jnp.bfloat16) for the MXU operands;
    accumulation stays in f32.  None keeps the input dtype (f32 here).
    """
    B, N, Fin = x.shape
    Fout = weight.shape[1]

    # --- batch-invariant adjacency, computed once outside the kernel (XLA) ---
    edge = jnp.einsum("k,kij->ij", coef.astype(jnp.float32), pre.astype(jnp.float32))
    adj = att.astype(jnp.float32) + edge                       # (N, N)

    # --- fold batch into the matmul M dimension ---
    x2d = x.reshape(B * N, Fin)                                # (B*N, Fin)
    w = weight
    if mxu_dtype is not None:
        x2d = x2d.astype(mxu_dtype)
        w = w.astype(mxu_dtype)
        adj = adj.astype(mxu_dtype)
    bias2 = bias.reshape(1, Fout).astype(jnp.float32)

    kernel = functools.partial(gcn_kernel, batch=B, node_n=N)

    out2d = pl.pallas_call(
        kernel,
        out_shape=jax.ShapeDtypeStruct((B * N, Fout), x.dtype),
        grid=(1,),
        in_specs=[
            pl.BlockSpec((B * N, Fin), lambda i: (0, 0)),      # x2d (whole)
            pl.BlockSpec((Fin, Fout), lambda i: (0, 0)),       # weight
            pl.BlockSpec((N, N), lambda i: (0, 0)),            # adjacency (att + edge)
            pl.BlockSpec((1, Fout), lambda i: (0, 0)),         # bias
        ],
        out_specs=pl.BlockSpec((B * N, Fout), lambda i: (0, 0)),
    )(x2d, w, adj, bias2)

    return out2d.reshape(B, N, Fout)


def make_params(key, in_features, out_features, node_n):
    """Deterministic re-implementation of reset_parameters()."""
    stdv = 1.0 / math.sqrt(out_features)
    ks = jax.random.split(key, 5)
    weight = jax.random.uniform(ks[0], (in_features, out_features),
                                minval=-stdv, maxval=stdv, dtype=jnp.float32)
    att = jax.random.uniform(ks[1], (node_n, node_n),
                             minval=-stdv, maxval=stdv, dtype=jnp.float32)
    # 10 scalar limb-relation parameters (larm_rleg ... lrleg)
    limb = jax.random.uniform(ks[2], (10,), minval=-stdv, maxval=stdv,
                              dtype=jnp.float32)
    bias = jax.random.uniform(ks[3], (out_features,), minval=-stdv, maxval=stdv,
                              dtype=jnp.float32)
    # coef[0] = bone = 0, coef[1..10] = limb params, coef[11] = down_lamb = 0
    coef = jnp.concatenate([jnp.zeros((1,), jnp.float32), limb,
                            jnp.zeros((1,), jnp.float32)])
    # TODO(synk): Graph(node_n).get_edge() class not provided; use deterministic
    # synthetic binary adjacency masks of the same shape (12, node_n, node_n).
    pre = (jax.random.uniform(ks[4], (12, node_n, node_n), dtype=jnp.float32)
           > 0.8).astype(jnp.float32)
    return weight, att, pre, coef, bias


if __name__ == "__main__":
    batch, node_n, in_features, out_features = 2, 48, 32, 32

    key = jax.random.PRNGKey(0)
    k_x, k_p = jax.random.split(key)
    x = jax.random.normal(k_x, (batch, node_n, in_features), dtype=jnp.float32)
    weight, att, pre, coef, bias = make_params(k_p, in_features, out_features, node_n)

    out = graph_convolution(x, weight, att, pre, coef, bias)
    out = jax.block_until_ready(out)

    # pure-JAX reference for sanity
    edge = jnp.einsum("k,kij->ij", coef, pre)
    support = jnp.matmul(x, weight)
    ref = jnp.matmul(att + edge, support) + bias
    assert out.shape == (batch, node_n, out_features)
    assert jnp.allclose(out, ref, atol=1e-4, rtol=1e-4)

    print("KERNEL_OK")
</pallas_src>

<mosaic_0001>
module attributes {stable_mosaic.version = 11 : i64} {
  func.func @gcn_kernel(%arg0: i32, %arg1: memref<96x32xf32, #tpu.memory_space<vmem>>, %arg2: memref<32x32xf32, #tpu.memory_space<vmem>>, %arg3: memref<48x48xf32, #tpu.memory_space<vmem>>, %arg4: memref<1x32xf32, #tpu.memory_space<vmem>>, %arg5: memref<96x32xf32, #tpu.memory_space<vmem>>) attributes {dimension_semantics = [#tpu.dimension_semantics<arbitrary>], iteration_bounds = array<i64: 1>, scalar_prefetch = 0 : i64, scratch_operands = 0 : i64, tpu.core_type = #tpu.core_type<tc>, window_params = [{pipeline_mode = #tpu.pipeline_mode<synchronous>, transform_indices = @transform_0, window_bounds = array<i64: 96, 32>}, {pipeline_mode = #tpu.pipeline_mode<synchronous>, transform_indices = @transform_1, window_bounds = array<i64: 32, 32>}, {pipeline_mode = #tpu.pipeline_mode<synchronous>, transform_indices = @transform_2, window_bounds = array<i64: 48, 48>}, {pipeline_mode = #tpu.pipeline_mode<synchronous>, transform_indices = @transform_3, window_bounds = array<i64: 1, 32>}, {pipeline_mode = #tpu.pipeline_mode<synchronous>, transform_indices = @transform_4, window_bounds = array<i64: 96, 32>}]} {
    %c0 = arith.constant 0 : index
    %c0_0 = arith.constant 0 : index
    %0 = vector.load %arg1[%c0, %c0_0] : memref<96x32xf32, #tpu.memory_space<vmem>>, vector<96x32xf32>
    %c0_1 = arith.constant 0 : index
    %c0_2 = arith.constant 0 : index
    %1 = vector.load %arg2[%c0_1, %c0_2] : memref<32x32xf32, #tpu.memory_space<vmem>>, vector<32x32xf32>
    %cst = arith.constant dense<0.000000e+00> : vector<96x32xf32>
    %2 = tpu.matmul %0, %1, %cst {dimension_numbers = #tpu.dot_dimension_numbers<[1], [0], [0], [1], [0, 0, 1, 1], [], []>} : vector<96x32xf32>, vector<32x32xf32>, vector<96x32xf32> -> vector<96x32xf32>
    %c0_3 = arith.constant 0 : index
    %c0_4 = arith.constant 0 : index
    %3 = vector.load %arg3[%c0_3, %c0_4] : memref<48x48xf32, #tpu.memory_space<vmem>>, vector<48x48xf32>
    %c0_5 = arith.constant 0 : index
    %c0_6 = arith.constant 0 : index
    %4 = vector.load %arg4[%c0_5, %c0_6] : memref<1x32xf32, #tpu.memory_space<vmem>>, vector<1x32xf32>
    %5 = vector.extract_strided_slice %2 {offsets = [0, 0], sizes = [48, 32], strides = [1, 1]} : vector<96x32xf32> to vector<48x32xf32>
    %cst_7 = arith.constant dense<0.000000e+00> : vector<48x32xf32>
    %6 = tpu.matmul %3, %5, %cst_7 {dimension_numbers = #tpu.dot_dimension_numbers<[1], [0], [0], [1], [0, 0, 1, 1], [], []>} : vector<48x48xf32>, vector<48x32xf32>, vector<48x32xf32> -> vector<48x32xf32>
    %7 = vector.broadcast %4 : vector<1x32xf32> to vector<48x32xf32>
    %8 = arith.addf %6, %7 : vector<48x32xf32>
    %c0_8 = arith.constant 0 : index
    %c0_9 = arith.constant 0 : index
    %9 = vector.load %arg5[%c0_8, %c0_9] : memref<96x32xf32, #tpu.memory_space<vmem>>, vector<48x32xf32>
    tpu.vector_store %arg5[%c0_8, %c0_9], %8 {strides = array<i32>} : memref<96x32xf32, #tpu.memory_space<vmem>>, vector<48x32xf32>,
    %10 = vector.extract_strided_slice %2 {offsets = [48, 0], sizes = [48, 32], strides = [1, 1]} : vector<96x32xf32> to vector<48x32xf32>
    %cst_10 = arith.constant dense<0.000000e+00> : vector<48x32xf32>
    %11 = tpu.matmul %3, %10, %cst_10 {dimension_numbers = #tpu.dot_dimension_numbers<[1], [0], [0], [1], [0, 0, 1, 1], [], []>} : vector<48x48xf32>, vector<48x32xf32>, vector<48x32xf32> -> vector<48x32xf32>
    %12 = vector.broadcast %4 : vector<1x32xf32> to vector<48x32xf32>
    %13 = arith.addf %11, %12 : vector<48x32xf32>
    %c48 = arith.constant 48 : index
    %c0_11 = arith.constant 0 : index
    %14 = vector.load %arg5[%c48, %c0_11] : memref<96x32xf32, #tpu.memory_space<vmem>>, vector<48x32xf32>
    tpu.vector_store %arg5[%c48, %c0_11], %13 {strides = array<i32>} : memref<96x32xf32, #tpu.memory_space<vmem>>, vector<48x32xf32>,
    return
  }
  func.func @transform_0(%arg0: i32) -> (i32, i32) {
    %c0_i32 = arith.constant 0 : i32
    %c0_i32_0 = arith.constant 0 : i32
    %c0_i32_1 = arith.constant 0 : i32
    return %c0_i32, %c0_i32_0 : i32, i32
  }
  func.func @transform_1(%arg0: i32) -> (i32, i32) {
    %c0_i32 = arith.constant 0 : i32
    %c0_i32_0 = arith.constant 0 : i32
    %c0_i32_1 = arith.constant 0 : i32
    return %c0_i32, %c0_i32_0 : i32, i32
  }
  func.func @transform_2(%arg0: i32) -> (i32, i32) {
    %c0_i32 = arith.constant 0 : i32
    %c0_i32_0 = arith.constant 0 : i32
    %c0_i32_1 = arith.constant 0 : i32
    return %c0_i32, %c0_i32_0 : i32, i32
  }
  func.func @transform_3(%arg0: i32) -> (i32, i32) {
    %c0_i32 = arith.constant 0 : i32
    %c0_i32_0 = arith.constant 0 : i32
    %c0_i32_1 = arith.constant 0 : i32
    return %c0_i32, %c0_i32_0 : i32, i32
  }
  func.func @transform_4(%arg0: i32) -> (i32, i32) {
    %c0_i32 = arith.constant 0 : i32
    %c0_i32_0 = arith.constant 0 : i32
    %c0_i32_1 = arith.constant 0 : i32
    return %c0_i32, %c0_i32_0 : i32, i32
  }
}

</mosaic_0001>

<bundles_post_ra>
// kernel: tpu_custom_call.1
= control target key start
LH: loop header
LB: loop body
LE: loop exit
PB: predicated region body
PF: predicated region fallthrough
CT: control target
= control target key end

     0   :  { %vm33_vm0 = vcmask 261120   ;;  %vm133_vm1 = vcmask 392192   ;;  %s433_s1 = inlined_call_operand.vmem [shape: f32[32,32], index: 1, kind: input, shape index: {}]   ;;  %s434_s0 = inlined_call_operand.vmem [shape: f32[96,32], index: 0, kind: input, shape index: {}]   ;;  %s435_s3 = inlined_call_operand.vmem [shape: f32[1,32], index: 3, kind: input, shape index: {}]   ;;  %s436_s2 = inlined_call_operand.vmem [shape: f32[48,48], index: 2, kind: input, shape index: {}]   ;;  %s437_s4 = inlined_call_operand.vmem [shape: f32[96,32], index: 4, kind: output, shape index: {}]  }
   0x1   :  { %v32_v0 = vld [vmem:[%s433_s1 + $0x18] sm:$0xff]  ;;  %v31_v1 = vld [vmem:[%s433_s1 + $0x10] sm:$0xff]  ;;  %v30_v2 = vld [vmem:[%s433_s1 + $0x8] sm:$0xff] }
   0x2   :  { %82 = vmatpush.msra.mxu0 %v32_v0  ;;  %262 = vmatpush.msra.mxu3 %v32_v0  ;;  %v29_v3 = vld [vmem:[%s433_s1] sm:$0xff]  ;;  %v24_v5 = vld [vmem:[%s434_s0 + $0x38] sm:$0xff]  ;;  %v18_v6 = vld [vmem:[%s434_s0 + $0x8] sm:$0xff] }
   0x3   :  { %v17_v4 = vld [vmem:[%s434_s0] sm:$0xff]  ;;  %v19_v8 = vld [vmem:[%s434_s0 + $0x10] sm:$0xff]  ;;  %v26_v9 = vld [vmem:[%s434_s0 + $0x48] sm:$0xff] }
   0x4   :  { %83 = vmatpush.msra.mxu0 %v31_v1  ;;  %263 = vmatpush.msra.mxu3 %v31_v1  ;;  %v25_v7 = vld [vmem:[%s434_s0 + $0x40] sm:$0xff]  ;;  %v20_v10 = vld [vmem:[%s434_s0 + $0x18] sm:$0xff]  ;;  %v27_v11 = vld [vmem:[%s434_s0 + $0x50] sm:$0xff] }
   0x5   :  { %v21_v12 = vld [vmem:[%s434_s0 + $0x20] sm:$0xff]  ;;  %v28_v13 = vld [vmem:[%s434_s0 + $0x58] sm:$0xff]  ;;  %v22_v14 = vld [vmem:[%s434_s0 + $0x28] sm:$0xff] }
   0x6   :  { %84 = vmatpush.msra.mxu0 %v30_v2  ;;  %264 = vmatpush.msra.mxu3 %v30_v2  ;;  %v23_v15 = vld [vmem:[%s434_s0 + $0x30] sm:$0xff]  ;;  %v123_v27 = vld [vmem:[%s436_s2] sm:$0xff]  ;;  %v124_v29 = vld [vmem:[%s436_s2 + $0x8] sm:$0xff] }
   0x7   :  { %v125_v30 = vld [vmem:[%s436_s2 + $0x10] sm:$0xff]  ;;  %v126_v31 = vld [vmem:[%s436_s2 + $0x18] sm:$0xff]  ;;  %v127_v32 = vld [vmem:[%s436_s2 + $0x20] sm:$0xff] }
   0x8   :  { %85 = vmatpush.msra.mxu0 %v29_v3  ;;  %265 = vmatpush.msra.mxu3 %v29_v3  ;;  %v128_v33 = vld [vmem:[%s436_s2 + $0x28] sm:$0xff]  ;;  %v266_v34 = vld [vmem:[%s435_s3] ss:$0 sm:$0xff] }
   0x9   :  { %238 = vmatmul.msk.f32.vlgmr.msra.gmra.mxu0 %vm33_vm0, %v17_v4  ;;  %245 = vmatmul.msk.f32.vlgmr.msra.gmra.mxu3 %vm33_vm0, %v24_v5 }
  0x11   :  { %239 = vmatmul.msk.f32.gmra.mxu0 %vm33_vm0, %v18_v6  ;;  %246 = vmatmul.msk.f32.gmra.mxu3 %vm33_vm0, %v25_v7 }
  0x19   :  { %240 = vmatmul.msk.f32.gmra.mxu0 %vm33_vm0, %v19_v8  ;;  %247 = vmatmul.msk.f32.gmra.mxu3 %vm33_vm0, %v26_v9 }
  0x21   :  { %241 = vmatmul.msk.f32.gmra.mxu0 %vm33_vm0, %v20_v10  ;;  %248 = vmatmul.msk.f32.gmra.mxu3 %vm33_vm0, %v27_v11 }
  0x29   :  { %242 = vmatmul.msk.f32.gmra.mxu0 %vm33_vm0, %v21_v12  ;;  %249 = vmatmul.msk.f32.gmra.mxu3 %vm33_vm0, %v28_v13 }
  0x31   :  { %243 = vmatmul.msk.f32.gmra.mxu0 %vm33_vm0, %v22_v14 }
  0x39   :  { %244 = vmatmul.msk.f32.gmra.mxu0 %vm33_vm0, %v23_v15 }
  0x86   :  { %v87_v16 = vpop.f32.mrf.mxu0 }
  0x8c   :  { %v108_v17 = vpop.f32.mrf.mxu3 }
  0x8e   :  { %v90_v18 = vpop.f32.mrf.mxu0 }
  0x94   :  { %v111_v19 = vpop.f32.mrf.mxu3 }
  0x96   :  { %v93_v20 = vpop.f32.mrf.mxu0 }
  0x9c   :  { %v114_v21 = vpop.f32.mrf.mxu3 }
  0x9e   :  { %v96_v22 = vpop.f32.mrf.mxu0 }
  0xa4   :  { %v117_v23 = vpop.f32.mrf.mxu3 }
  0xa6   :  { %v99_v24 = vpop.f32.mrf.mxu0 }
  0xac   :  { %v120_v25 = vpop.f32.mrf.mxu3 }
  0xad   :  { %203 = vmatpush.msra.mxu2 %v120_v25 }
  0xae   :  { %v102_v26 = vpop.f32.mrf.mxu0 }
  0xaf   :  { %162 = vmatpush.msra.mxu1 %v102_v26  ;;  %204 = vmatpush.msra.mxu2 %v117_v23 }
  0xb1   :  { %163 = vmatpush.msra.mxu1 %v99_v24  ;;  %205 = vmatpush.msra.mxu2 %v114_v21 }
  0xb3   :  { %164 = vmatpush.msra.mxu1 %v96_v22  ;;  %206 = vmatpush.msra.mxu2 %v111_v19 }
  0xb5   :  { %165 = vmatpush.msra.mxu1 %v93_v20  ;;  %207 = vmatpush.msra.mxu2 %v108_v17 }
  0xb6   :  { %v105_v28 = vpop.f32.mrf.mxu0 }
  0xb7   :  { %166 = vmatpush.msra.mxu1 %v90_v18  ;;  %208 = vmatpush.msra.mxu2 %v105_v28 }
  0xb8   :  { %256 = vmatmul.msk.f32.vlgmr.msra.gmra.mxu2 %vm133_vm1, %v123_v27 }
  0xb9   :  { %167 = vmatpush.msra.mxu1 %v87_v16 }
  0xba   :  { %250 = vmatmul.msk.f32.vlgmr.msra.gmra.mxu1 %vm133_vm1, %v123_v27 }
  0xc0   :  { %257 = vmatmul.msk.f32.gmra.mxu2 %vm133_vm1, %v124_v29 }
  0xc2   :  { %251 = vmatmul.msk.f32.gmra.mxu1 %vm133_vm1, %v124_v29 }
  0xc8   :  { %258 = vmatmul.msk.f32.gmra.mxu2 %vm133_vm1, %v125_v30 }
  0xca   :  { %252 = vmatmul.msk.f32.gmra.mxu1 %vm133_vm1, %v125_v30 }
  0xd0   :  { %259 = vmatmul.msk.f32.gmra.mxu2 %vm133_vm1, %v126_v31 }
  0xd2   :  { %253 = vmatmul.msk.f32.gmra.mxu1 %vm133_vm1, %v126_v31 }
  0xd8   :  { %260 = vmatmul.msk.f32.gmra.mxu2 %vm133_vm1, %v127_v32 }
  0xda   :  { %254 = vmatmul.msk.f32.gmra.mxu1 %vm133_vm1, %v127_v32 }
  0xe0   :  { %261 = vmatmul.msk.f32.gmra.mxu2 %vm133_vm1, %v128_v33 }
  0xe2   :  { %255 = vmatmul.msk.f32.gmra.mxu1 %vm133_vm1, %v128_v33 }
 0x137   :  { %v169_v35 = vpop.f32.mrf.mxu1 }
 0x138   :  { %v170_v36 = vadd.f32 %v266_v34, %v169_v35 }
 0x13a   :  { %187 = vst.msk [vmem:[%s437_s4] sm:$0xff] %vm33_vm0, %v170_v36 }
 0x13b   :  { %v210_v37 = vpop.f32.mrf.mxu2 }
 0x13c   :  { %v211_v38 = vadd.f32 %v266_v34, %v210_v37 }
 0x13e   :  { %228 = vst.msk [vmem:[%s437_s4 + $0x30] sm:$0xff] %vm33_vm0, %v211_v38 }
 0x13f   :  { %v172_v39 = vpop.f32.mrf.mxu1 }
 0x140   :  { %v173_v40 = vadd.f32 %v266_v34, %v172_v39 }
 0x142   :  { %188 = vst.msk [vmem:[%s437_s4 + $0x8] sm:$0xff] %vm33_vm0, %v173_v40 }
 0x143   :  { %v213_v41 = vpop.f32.mrf.mxu2 }
 0x144   :  { %v214_v42 = vadd.f32 %v266_v34, %v213_v41 }
 0x146   :  { %229 = vst.msk [vmem:[%s437_s4 + $0x38] sm:$0xff] %vm33_vm0, %v214_v42 }
 0x147   :  { %v175_v43 = vpop.f32.mrf.mxu1 }
 0x148   :  { %v176_v44 = vadd.f32 %v266_v34, %v175_v43 }
 0x14a   :  { %189 = vst.msk [vmem:[%s437_s4 + $0x10] sm:$0xff] %vm33_vm0, %v176_v44 }
 0x14b   :  { %v216_v45 = vpop.f32.mrf.mxu2 }
 0x14c   :  { %v217_v46 = vadd.f32 %v266_v34, %v216_v45 }
 0x14e   :  { %230 = vst.msk [vmem:[%s437_s4 + $0x40] sm:$0xff] %vm33_vm0, %v217_v46 }
 0x14f   :  { %v178_v47 = vpop.f32.mrf.mxu1 }
 0x150   :  { %v179_v48 = vadd.f32 %v266_v34, %v178_v47 }
 0x152   :  { %190 = vst.msk [vmem:[%s437_s4 + $0x18] sm:$0xff] %vm33_vm0, %v179_v48 }
 0x153   :  { %v219_v49 = vpop.f32.mrf.mxu2 }
 0x154   :  { %v220_v50 = vadd.f32 %v266_v34, %v219_v49 }
 0x156   :  { %231 = vst.msk [vmem:[%s437_s4 + $0x48] sm:$0xff] %vm33_vm0, %v220_v50 }
 0x157   :  { %v181_v51 = vpop.f32.mrf.mxu1 }
 0x158   :  { %v182_v52 = vadd.f32 %v266_v34, %v181_v51 }
 0x15a   :  { %191 = vst.msk [vmem:[%s437_s4 + $0x20] sm:$0xff] %vm33_vm0, %v182_v52 }
 0x15b   :  { %v222_v53 = vpop.f32.mrf.mxu2 }
 0x15c   :  { %v223_v54 = vadd.f32 %v266_v34, %v222_v53 }
 0x15e   :  { %232 = vst.msk [vmem:[%s437_s4 + $0x50] sm:$0xff] %vm33_vm0, %v223_v54 }
 0x15f   :  { %v184_v55 = vpop.f32.mrf.mxu1 }
 0x160   :  { %v185_v56 = vadd.f32 %v266_v34, %v184_v55 }
 0x162   :  { %192 = vst.msk [vmem:[%s437_s4 + $0x28] sm:$0xff] %vm33_vm0, %v185_v56 }
 0x163   :  { %v225_v57 = vpop.f32.mrf.mxu2 }
 0x164   :  { %v226_v58 = vadd.f32 %v266_v34, %v225_v57 }
 0x166   :  { %233 = vst.msk [vmem:[%s437_s4 + $0x58] sm:$0xff] %vm33_vm0, %v226_v58 }

</bundles_post_ra>
